<compile_context>
chip_gen: v5e
topology: v5e:2x2
jax: 0.10.0
libtpu: 0.0.40
codegen_flags: <defaults>
</compile_context>

<pallas_src>
import jax
import jax.numpy as jnp
from jax import lax
from jax.experimental import pallas as pl
from jax.experimental.pallas import tpu as pltpu

_LN_EPS = 1e-12


def _self_output_kernel(h_ref, x_ref, w_ref, b_ref, g_ref, beta_ref, o_ref):
    # h_ref, x_ref, o_ref: (TM, H); w_ref: (H_in, H_out) pre-transposed; b/g/beta: (1, H)
    # Dense: h @ W^T + b, done as h @ w_t. Operands stay in their native dtype
    # (bf16 hits the MXU natively); accumulate in f32.
    y = jnp.dot(h_ref[...], w_ref[...], preferred_element_type=jnp.float32)
    y = y + b_ref[...].astype(jnp.float32)

    # TODO(synk): dropout has no deterministic inference-time effect; implemented as
    #             identity (training-mode stochastic dropout would use pltpu.prng_*).
    y = y + x_ref[...].astype(jnp.float32)

    # LayerNorm over last dim (TF style, eps inside sqrt). Two-pass variance
    # (cancellation-safe); rsqrt uses the EUP slot instead of a VPU divide.
    m = jnp.mean(y, axis=-1, keepdims=True)
    d = y - m
    var = jnp.mean(d * d, axis=-1, keepdims=True)
    yn = d * lax.rsqrt(var + _LN_EPS)

    out = g_ref[...].astype(jnp.float32) * yn + beta_ref[...].astype(jnp.float32)
    o_ref[...] = out.astype(o_ref.dtype)


def _round_up(x, m):
    return (x + m - 1) // m * m


def _choose_tm(R, H, act_bytes):
    # Per-row VMEM cost: 2 streamed inputs + 1 output (double-buffered) + ~4 f32
    # staging rows (matmul result / LN intermediates).
    per_row = 3 * 2 * H * act_bytes + 4 * H * 4
    budget = 24 << 20  # conservative: safe inside v7x's 64 MiB physical VMEM
    cap = max(8, budget // max(per_row, 1))
    tm = 8
    for cand in (512, 256, 128, 64, 32, 16, 8):
        if cand <= cap:
            tm = cand
            break
    if R <= tm:
        tm = _round_up(R, 8)  # tiny inputs: one tile, sublane-aligned
    return tm


def bert_self_output(hidden_states, input_tensor, weight, bias, gamma, beta):
    """
    hidden_states, input_tensor: (B, S, H)
    weight: (H, H)  -- PyTorch nn.Linear convention (out_features, in_features)
    bias, gamma, beta: (H,)
    """
    B, S, H = hidden_states.shape
    R = B * S
    act_dtype = hidden_states.dtype
    act_bytes = jnp.dtype(act_dtype).itemsize

    # One-time wrapper transpose: (out, in) -> (in, out). Contraction dim of the RHS
    # now lives on sublanes -> no per-grid-step weight relayout through the XLU.
    # Match the activation dtype so bf16 activations get a bf16 MXU matmul.
    w_t = jnp.asarray(weight, dtype=act_dtype).T
    w_bytes = jnp.dtype(w_t.dtype).itemsize

    h2 = hidden_states.reshape(R, H)
    x2 = input_tensor.reshape(R, H)
    b2 = bias.reshape(1, H)
    g2 = gamma.reshape(1, H)
    beta2 = beta.reshape(1, H)

    TM = _choose_tm(R, H, act_bytes)
    Rp = _round_up(R, TM)
    if Rp != R:
        pad = Rp - R
        h2 = jnp.pad(h2, ((0, pad), (0, 0)))
        x2 = jnp.pad(x2, ((0, pad), (0, 0)))
    grid = (Rp // TM,)

    cost = pl.CostEstimate(
        flops=2 * Rp * H * H,
        transcendentals=Rp,  # one rsqrt per row
        bytes_accessed=3 * Rp * H * act_bytes + H * H * w_bytes,
    )

    # VMEM footprint estimate: streamed tiles (double-buffered) + single-buffered
    # weight + f32 staging. Clamp to [32 MiB, 48 MiB]: above v5e's 16 MiB default
    # scoped limit, comfortably below v7x's 64 MiB physical VMEM.
    tile_bytes = TM * H * act_bytes
    est = 3 * 2 * tile_bytes + H * H * w_bytes + 4 * TM * H * 4 + (1 << 20)
    vmem_limit = int(min(max(est, 32 << 20), 48 << 20))

    resident = dict(pipeline_mode=pl.Buffered(1))  # constant index_map -> 1 buffer

    out = pl.pallas_call(
        _self_output_kernel,
        out_shape=jax.ShapeDtypeStruct((Rp, H), act_dtype),
        grid=grid,
        in_specs=[
            pl.BlockSpec((TM, H), lambda i: (i, 0)),            # hidden rows (streamed)
            pl.BlockSpec((TM, H), lambda i: (i, 0)),            # residual rows (streamed)
            pl.BlockSpec((H, H), lambda i: (0, 0), **resident),  # weight: VMEM-resident
            pl.BlockSpec((1, H), lambda i: (0, 0), **resident),  # bias
            pl.BlockSpec((1, H), lambda i: (0, 0), **resident),  # gamma
            pl.BlockSpec((1, H), lambda i: (0, 0), **resident),  # beta
        ],
        out_specs=pl.BlockSpec((TM, H), lambda i: (i, 0)),
        compiler_params=pltpu.CompilerParams(
            dimension_semantics=("parallel",),
            vmem_limit_bytes=vmem_limit,
        ),
        cost_estimate=cost,
    )(h2, x2, w_t, b2, g2, beta2)

    return out[:R].reshape(B, S, H)


def _reference(hidden_states, input_tensor, weight, bias, gamma, beta):
    h = hidden_states.astype(jnp.float32)
    x = input_tensor.astype(jnp.float32)
    w = weight.astype(jnp.float32)
    y = jnp.einsum("bsh,oh->bso", h, w) + bias.astype(jnp.float32)
    y = y + x
    u = jnp.mean(y, axis=-1, keepdims=True)
    s = jnp.mean((y - u) ** 2, axis=-1, keepdims=True)
    y = (y - u) / jnp.sqrt(s + _LN_EPS)
    return gamma.astype(jnp.float32) * y + beta.astype(jnp.float32)


if __name__ == "__main__":
    key = jax.random.PRNGKey(0)
    k1, k2, k3, k4 = jax.random.split(key, 4)

    # ---- case 1: f32, small BERT-ish shape ----
    B, S, H = 2, 8, 32
    hidden_states = jax.random.normal(k1, (B, S, H), dtype=jnp.float32)
    input_tensor = jax.random.normal(k2, (B, S, H), dtype=jnp.float32)
    weight = jax.random.normal(k3, (H, H), dtype=jnp.float32) * 0.02
    bias = jax.random.normal(k4, (H,), dtype=jnp.float32) * 0.02
    gamma = jnp.ones((H,), dtype=jnp.float32)
    beta = jnp.zeros((H,), dtype=jnp.float32)

    out = bert_self_output(hidden_states, input_tensor, weight, bias, gamma, beta)
    out = jax.block_until_ready(out)
    ref = _reference(hidden_states, input_tensor, weight, bias, gamma, beta)
    assert out.shape == (B, S, H)
    assert jnp.allclose(out, ref, atol=1e-5, rtol=1e-5), "f32 mismatch vs reference"

    # ---- case 2: bf16 activations/weight (native bf16 MXU path), f32 accumulate ----
    h_bf = hidden_states.astype(jnp.bfloat16)
    x_bf = input_tensor.astype(jnp.bfloat16)
    w_bf = weight.astype(jnp.bfloat16)
    out_bf = bert_self_output(h_bf, x_bf, w_bf, bias, gamma, beta)
    out_bf = jax.block_until_ready(out_bf)
    ref_bf = _reference(h_bf, x_bf, w_bf, bias, gamma, beta)
    assert out_bf.dtype == jnp.bfloat16
    assert jnp.allclose(out_bf.astype(jnp.float32), ref_bf, atol=3e-2, rtol=3e-2), \
        "bf16 mismatch vs reference"

    # ---- case 3: f32, awkward row count (exercises the row-padding path) ----
    B3, S3, H3 = 2, 9, 128
    kk1, kk2, kk3, kk4 = jax.random.split(jax.random.PRNGKey(1), 4)
    h3 = jax.random.normal(kk1, (B3, S3, H3), dtype=jnp.float32)
    x3 = jax.random.normal(kk2, (B3, S3, H3), dtype=jnp.float32)
    w3 = jax.random.normal(kk3, (H3, H3), dtype=jnp.float32) * 0.02
    b3 = jax.random.normal(kk4, (H3,), dtype=jnp.float32) * 0.02
    g3 = jnp.ones((H3,), dtype=jnp.float32)
    be3 = jnp.zeros((H3,), dtype=jnp.float32)
    out3 = jax.block_until_ready(bert_self_output(h3, x3, w3, b3, g3, be3))
    ref3 = _reference(h3, x3, w3, b3, g3, be3)
    assert out3.shape == (B3, S3, H3)
    assert jnp.allclose(out3, ref3, atol=1e-5, rtol=1e-5), "padded-rows mismatch vs reference"

    print("KERNEL_OK")
</pallas_src>

<mosaic_0001>
module attributes {stable_mosaic.version = 11 : i64} {
  func.func @_self_output_kernel(%arg0: i32, %arg1: memref<16x32xf32, #tpu.memory_space<vmem>>, %arg2: memref<16x32xf32, #tpu.memory_space<vmem>>, %arg3: memref<32x32xf32, #tpu.memory_space<vmem>>, %arg4: memref<1x32xf32, #tpu.memory_space<vmem>>, %arg5: memref<1x32xf32, #tpu.memory_space<vmem>>, %arg6: memref<1x32xf32, #tpu.memory_space<vmem>>, %arg7: memref<16x32xf32, #tpu.memory_space<vmem>>) attributes {dimension_semantics = [#tpu.dimension_semantics<parallel>], iteration_bounds = array<i64: 1>, scalar_prefetch = 0 : i64, scratch_operands = 0 : i64, tpu.core_type = #tpu.core_type<tc>, window_params = [{transform_indices = @transform_0, window_bounds = array<i64: 16, 32>}, {transform_indices = @transform_1, window_bounds = array<i64: 16, 32>}, {pipeline_mode = #tpu.pipeline_mode<synchronous>, transform_indices = @transform_2, window_bounds = array<i64: 32, 32>}, {pipeline_mode = #tpu.pipeline_mode<synchronous>, transform_indices = @transform_3, window_bounds = array<i64: 1, 32>}, {pipeline_mode = #tpu.pipeline_mode<synchronous>, transform_indices = @transform_4, window_bounds = array<i64: 1, 32>}, {pipeline_mode = #tpu.pipeline_mode<synchronous>, transform_indices = @transform_5, window_bounds = array<i64: 1, 32>}, {transform_indices = @transform_6, window_bounds = array<i64: 16, 32>}]} {
    %c0 = arith.constant 0 : index
    %c0_0 = arith.constant 0 : index
    %0 = vector.load %arg1[%c0, %c0_0] : memref<16x32xf32, #tpu.memory_space<vmem>>, vector<16x32xf32>
    %c0_1 = arith.constant 0 : index
    %c0_2 = arith.constant 0 : index
    %1 = vector.load %arg3[%c0_1, %c0_2] : memref<32x32xf32, #tpu.memory_space<vmem>>, vector<32x32xf32>
    %cst = arith.constant dense<0.000000e+00> : vector<16x32xf32>
    %2 = tpu.matmul %0, %1, %cst {dimension_numbers = #tpu.dot_dimension_numbers<[1], [0], [0], [1], [0, 0, 1, 1], [], []>} : vector<16x32xf32>, vector<32x32xf32>, vector<16x32xf32> -> vector<16x32xf32>
    %c0_3 = arith.constant 0 : index
    %c0_4 = arith.constant 0 : index
    %3 = vector.load %arg4[%c0_3, %c0_4] : memref<1x32xf32, #tpu.memory_space<vmem>>, vector<1x32xf32>
    %4 = vector.broadcast %3 : vector<1x32xf32> to vector<16x32xf32>
    %5 = arith.addf %2, %4 : vector<16x32xf32>
    %c0_5 = arith.constant 0 : index
    %c0_6 = arith.constant 0 : index
    %6 = vector.load %arg2[%c0_5, %c0_6] : memref<16x32xf32, #tpu.memory_space<vmem>>, vector<16x32xf32>
    %7 = arith.addf %5, %6 : vector<16x32xf32>
    %cst_7 = arith.constant dense<0.000000e+00> : vector<16xf32>
    %8 = vector.multi_reduction <add>, %7, %cst_7 [1] : vector<16x32xf32> to vector<16xf32>
    %9 = vector.shape_cast %8 : vector<16xf32> to vector<16x1xf32>
    %cst_8 = arith.constant 3.200000e+01 : f32
    %10 = vector.broadcast %cst_8 : f32 to vector<16x1xf32>
    %11 = arith.divf %9, %10 : vector<16x1xf32>
    %12 = vector.broadcast %11 : vector<16x1xf32> to vector<16x32xf32>
    %13 = arith.subf %7, %12 : vector<16x32xf32>
    %14 = arith.mulf %13, %13 : vector<16x32xf32>
    %cst_9 = arith.constant dense<0.000000e+00> : vector<16xf32>
    %15 = vector.multi_reduction <add>, %14, %cst_9 [1] : vector<16x32xf32> to vector<16xf32>
    %16 = vector.shape_cast %15 : vector<16xf32> to vector<16x1xf32>
    %cst_10 = arith.constant 3.200000e+01 : f32
    %17 = vector.broadcast %cst_10 : f32 to vector<16x1xf32>
    %18 = arith.divf %16, %17 : vector<16x1xf32>
    %cst_11 = arith.constant 9.99999996E-13 : f32
    %19 = vector.broadcast %cst_11 : f32 to vector<16x1xf32>
    %20 = arith.addf %18, %19 : vector<16x1xf32>
    %21 = math.rsqrt %20 : vector<16x1xf32>
    %22 = vector.broadcast %21 : vector<16x1xf32> to vector<16x32xf32>
    %23 = arith.mulf %13, %22 : vector<16x32xf32>
    %c0_12 = arith.constant 0 : index
    %c0_13 = arith.constant 0 : index
    %24 = vector.load %arg5[%c0_12, %c0_13] : memref<1x32xf32, #tpu.memory_space<vmem>>, vector<1x32xf32>
    %25 = vector.broadcast %24 : vector<1x32xf32> to vector<16x32xf32>
    %26 = arith.mulf %25, %23 : vector<16x32xf32>
    %c0_14 = arith.constant 0 : index
    %c0_15 = arith.constant 0 : index
    %27 = vector.load %arg6[%c0_14, %c0_15] : memref<1x32xf32, #tpu.memory_space<vmem>>, vector<1x32xf32>
    %28 = vector.broadcast %27 : vector<1x32xf32> to vector<16x32xf32>
    %29 = arith.addf %26, %28 : vector<16x32xf32>
    %c0_16 = arith.constant 0 : index
    %c0_17 = arith.constant 0 : index
    %30 = vector.load %arg7[%c0_16, %c0_17] : memref<16x32xf32, #tpu.memory_space<vmem>>, vector<16x32xf32>
    tpu.vector_store %arg7[%c0_16, %c0_17], %29 {strides = array<i32>} : memref<16x32xf32, #tpu.memory_space<vmem>>, vector<16x32xf32>,
    return
  }
  func.func @transform_0(%arg0: i32) -> (i32, i32) {
    %c0_i32 = arith.constant 0 : i32
    %c0_i32_0 = arith.constant 0 : i32
    return %arg0, %c0_i32 : i32, i32
  }
  func.func @transform_1(%arg0: i32) -> (i32, i32) {
    %c0_i32 = arith.constant 0 : i32
    %c0_i32_0 = arith.constant 0 : i32
    return %arg0, %c0_i32 : i32, i32
  }
  func.func @transform_2(%arg0: i32) -> (i32, i32) {
    %c0_i32 = arith.constant 0 : i32
    %c0_i32_0 = arith.constant 0 : i32
    %c0_i32_1 = arith.constant 0 : i32
    return %c0_i32, %c0_i32_0 : i32, i32
  }
  func.func @transform_3(%arg0: i32) -> (i32, i32) {
    %c0_i32 = arith.constant 0 : i32
    %c0_i32_0 = arith.constant 0 : i32
    %c0_i32_1 = arith.constant 0 : i32
    return %c0_i32, %c0_i32_0 : i32, i32
  }
  func.func @transform_4(%arg0: i32) -> (i32, i32) {
    %c0_i32 = arith.constant 0 : i32
    %c0_i32_0 = arith.constant 0 : i32
    %c0_i32_1 = arith.constant 0 : i32
    return %c0_i32, %c0_i32_0 : i32, i32
  }
  func.func @transform_5(%arg0: i32) -> (i32, i32) {
    %c0_i32 = arith.constant 0 : i32
    %c0_i32_0 = arith.constant 0 : i32
    %c0_i32_1 = arith.constant 0 : i32
    return %c0_i32, %c0_i32_0 : i32, i32
  }
  func.func @transform_6(%arg0: i32) -> (i32, i32) {
    %c0_i32 = arith.constant 0 : i32
    %c0_i32_0 = arith.constant 0 : i32
    return %arg0, %c0_i32 : i32, i32
  }
}

</mosaic_0001>

<bundles_post_ra>
// kernel: tpu_custom_call.1
= control target key start
LH: loop header
LB: loop body
LE: loop exit
PB: predicated region body
PF: predicated region fallthrough
CT: control target
= control target key end

     0   :  { %11 = vsyncpa [#allocation3], 0  ;;  %s407_s0 = inlined_call_operand.hbm [shape: f32[16,32], index: 0, kind: input, shape index: {}]   ;;  %s408_s1 = inlined_call_operand.hbm [shape: f32[16,32], index: 1, kind: input, shape index: {}]   ;;  %s409_s2 = inlined_call_operand.hbm [shape: f32[32,32], index: 2, kind: input, shape index: {}]   ;;  %s410_s3 = inlined_call_operand.vmem [shape: f32[1,32], index: 3, kind: input, shape index: {}]   ;;  %s411_s4 = inlined_call_operand.vmem [shape: f32[1,32], index: 4, kind: input, shape index: {}]   ;;  %s412_s5 = inlined_call_operand.vmem [shape: f32[1,32], index: 5, kind: input, shape index: {}]   ;;  %s413_s6 = inlined_call_operand.hbm [shape: f32[16,32], index: 6, kind: output, shape index: {}]  }
   0x1   :  { %12 = vsyncpa [#allocation6], 0 }
   0x2   :  { %13 = vsyncpa [#allocation4], 0  ;;  %s31_s23 = sshll.u32 %s408_s1, 4  ;;  %s324_s24 = smov [#allocation5]   ;;  %s32_s23 = int_to_ptr.hbm [resolvable:$true] %s31_s23 }
   0x3   :  { %s33_s25 = sshll.u32 %s324_s24, 4  ;;  %s18_s28 = sshll.u32 %s407_s0, 4  ;;  %s34_s25 = int_to_ptr.vmem [resolvable:$true] %s33_s25  ;;  %s19_s28 = int_to_ptr.hbm [resolvable:$true] %s18_s28 }
   0x4   :  { %s325_s29 = smov 128   ;;  %s326_s30 = smov 8  }
   0x5   :  { %39 = dma.hbm_to_vmem [thread:$0]  %s32_s23, 256, %s34_s25, [#allocation6], %s325_s29, %s325_s29, %s326_s30  }
   0x6   :  { %s327_s7 = smov [#allocation2]   ;;  %s44_s1 = sshll.u32 %s409_s2, 4  ;;  %s45_s1 = int_to_ptr.hbm [resolvable:$true] %s44_s1 }
   0x7   :  { %s20_s8 = sshll.u32 %s327_s7, 4  ;;  %s328_s0 = smov [#allocation7]   ;;  %s21_s8 = int_to_ptr.vmem [resolvable:$true] %s20_s8 }
   0x8   :  { %26 = dma.hbm_to_vmem [thread:$0]  %s19_s28, 256, %s21_s8, [#allocation3], %s325_s29, %s325_s29, %s326_s30  }
   0x9   :  { %s46_s11 = sshll.u32 %s328_s0, 4  ;;  %s47_s11 = int_to_ptr.vmem [resolvable:$true] %s46_s11 }
   0xa   :  { %52 = dma.hbm_to_vmem [thread:$0]  %s45_s1, 512, %s47_s11, [#allocation6], %s325_s29, %s325_s29, %s326_s30  }
   0xb   :  { %318 = dma.done.wait [#allocation3], 256  }
   0xc   :  { %319 = vsyncadd [#allocation3], 4294967040 }
   0xd   :  { %320 = dma.done.wait [#allocation6], 768  }
   0xe   :  { %321 = vsyncadd [#allocation6], 4294966528  ;;  %v76_v0 = vld [vmem:[#allocation7 + $0x18] sm:$0xff]  ;;  %v75_v1 = vld [vmem:[#allocation7 + $0x10] sm:$0xff]  ;;  %vm81_vm0 = vcmask 261120   ;;  %v329_v17 = vmov 32.0  }
   0xf   :  { %100 = vmatpush.msra.mxu0 %v76_v0  ;;  %202 = vmatpush.msra.mxu1 %v76_v0  ;;  %v74_v2 = vld [vmem:[#allocation7 + $0x8] sm:$0xff]  ;;  %v73_v3 = vld [vmem:[#allocation7] sm:$0xff]  ;;  %v111_v8 = vld [vmem:[#allocation5] sm:$0xff]  ;;  %216 = vrcp.f32 %v329_v17  ;;  %s186_s19 = sshll.u32 %s413_s6, 4  ;;  %s187_s19 = int_to_ptr.hbm [resolvable:$true] %s186_s19 }
  0x10   :  { %v71_v4 = vld [vmem:[#allocation2] sm:$0xff]  ;;  %v72_v5 = vld [vmem:[#allocation2 + $0x8] sm:$0xff]  ;;  %v112_v13 = vld [vmem:[#allocation5 + $0x8] sm:$0xff] }
  0x11   :  { %101 = vmatpush.msra.mxu0 %v75_v1  ;;  %203 = vmatpush.msra.mxu1 %v75_v1  ;;  %v213_v6 = vld [vmem:[%s410_s3] ss:$0 sm:$0xff] }
  0x12   :  { %v214_v48 = vld [vmem:[%s411_s4] ss:$0 sm:$0xff]  ;;  %s330_s4 = smov [#allocation8]  }
  0x13   :  { %102 = vmatpush.msra.mxu0 %v74_v2  ;;  %204 = vmatpush.msra.mxu1 %v74_v2  ;;  %v215_v52 = vld [vmem:[%s412_s5] ss:$0 sm:$0xff]  ;;  %s184_s16 = sshll.u32 %s330_s4, 4  ;;  %s185_s16 = int_to_ptr.vmem [resolvable:$true] %s184_s16 }
  0x15   :  { %103 = vmatpush.msra.mxu0 %v73_v3  ;;  %205 = vmatpush.msra.mxu1 %v73_v3  ;;  %v217_v18 = vpop.eup %216 }
  0x16   :  { %200 = vmatmul.msk.f32.vlgmr.msra.gmra.mxu0 %vm81_vm0, %v71_v4  ;;  %201 = vmatmul.msk.f32.vlgmr.msra.gmra.mxu1 %vm81_vm0, %v72_v5  ;;  %v122_v19 = vmul.f32 32.0, %v217_v18  ;;  %vm126_vm1 = vweird.f32 %v217_v18 }
  0x18   :  { %v123_v20 = vsub.f32 1.0, %v122_v19 }
  0x1a   :  { %v124_v21 = vmul.f32 %v217_v18, %v123_v20 }
  0x1c   :  { %v125_v22 = vadd.f32 %v217_v18, %v124_v21 }
  0x1e   :  { %v127_v23 = vsel %vm126_vm1, %v217_v18, %v125_v22 }
  0x93   :  { %v105_v7 = vpop.f32.mrf.mxu0  ;;  %v108_v9 = vpop.f32.mrf.mxu1 }
  0x94   :  { %v106_v10 = vadd.f32 %v213_v6, %v105_v7  ;;  %v109_v12 = vadd.f32 %v213_v6, %v108_v9 }
  0x96   :  { %v113_v11 = vadd.f32 %v111_v8, %v106_v10  ;;  %v114_v15 = vadd.f32 %v112_v13, %v109_v12 }
  0x98   :  { %v115_v14 = vsel %vm81_vm0, %v113_v11, 0.0  ;;  %v118_v16 = vsel %vm81_vm0, %v114_v15, 0.0 }
  0x99   :  { %116 = vadd.xlane.f32.xlu0 %v115_v14 }
  0xa1   :  { %119 = vadd.xlane.f32.xlu0 %v118_v16 }
 0x10c   :  { %v117_v24 = vpop.xlane.xlu0 %116 }
 0x10d   :  { %v128_v25 = vmul.f32 %v127_v23, %v117_v24 }
 0x10f   :  { %v130_v26 = vsub.f32 %v113_v11, %v128_v25 }
 0x111   :  { %v132_v27 = vmul.f32 %v130_v26, %v130_v26 }
 0x113   :  { %v134_v28 = vsel %vm81_vm0, %v132_v27, 0.0 }
 0x114   :  { %135 = vadd.xlane.f32.xlu1 %v134_v28  ;;  %v120_v29 = vpop.xlane.xlu0 %119 }
 0x115   :  { %v129_v30 = vmul.f32 %v127_v23, %v120_v29 }
 0x117   :  { %v131_v31 = vsub.f32 %v114_v15, %v129_v30 }
 0x119   :  { %v133_v32 = vmul.f32 %v131_v31, %v131_v31 }
 0x11b   :  { %v137_v33 = vsel %vm81_vm0, %v133_v32, 0.0 }
 0x11c   :  { %138 = vadd.xlane.f32.xlu1 %v137_v33 }
 0x187   :  { %v136_v34 = vpop.xlane.xlu1 %135 }
 0x188   :  { %v140_v35 = vmul.f32 %v136_v34, %v127_v23 }
 0x18a   :  { %v142_v36 = vadd.f32 1e-12, %v140_v35 }
 0x18c   :  { %218 = vrsqrt.f32 %v142_v36  ;;  %vm150_vm3 = vweird.f32 %v142_v36 }
 0x18f   :  { %v139_v37 = vpop.xlane.xlu1 %138 }
 0x190   :  { %v141_v38 = vmul.f32 %v139_v37, %v127_v23 }
 0x192   :  { %v219_v39 = vpop.eup %218  ;;  %v143_v40 = vadd.f32 1e-12, %v141_v38 }
 0x193   :  { %v145_v41 = vmul.f32 %v219_v39, %v142_v36  ;;  %vm151_vm2 = vweird.f32 %v219_v39 }
 0x194   :  { %220 = vrsqrt.f32 %v143_v40  ;;  %vm152_vm4 = vmor %vm150_vm3, %vm151_vm2  ;;  %vm160_vm6 = vweird.f32 %v143_v40 }
 0x195   :  { %v146_v42 = vmul.f32 %v219_v39, %v145_v41 }
 0x197   :  { %v147_v43 = vmul.f32 0.5, %v146_v42 }
 0x199   :  { %v148_v44 = vsub.f32 1.5, %v147_v43 }
 0x19a   :  { %v221_v45 = vpop.eup %220 }
 0x19b   :  { %v149_v46 = vmul.f32 %v219_v39, %v148_v44  ;;  %v155_v47 = vmul.f32 %v221_v45, %v143_v40  ;;  %vm161_vm5 = vweird.f32 %v221_v45 }
 0x19c   :  { %vm162_vm7 = vmor %vm160_vm6, %vm161_vm5 }
 0x19d   :  { %v153_v49 = vsel %vm152_vm4, %v219_v39, %v149_v46  ;;  %v156_v50 = vmul.f32 %v221_v45, %v155_v47 }
 0x19e   :  { %v164_v51 = vmul.f32 %v153_v49, %v130_v26 }
 0x19f   :  { %v157_v53 = vmul.f32 0.5, %v156_v50 }
 0x1a0   :  { %v170_v54 = vmul.f32 %v214_v48, %v164_v51 }
 0x1a1   :  { %v158_v55 = vsub.f32 1.5, %v157_v53 }
 0x1a2   :  { %v176_v56 = vadd.f32 %v215_v52, %v170_v54 }
 0x1a3   :  { %v159_v57 = vmul.f32 %v221_v45, %v158_v55 }
 0x1a4   :  { %178 = vst.msk [vmem:[#allocation8] sm:$0xff] %vm81_vm0, %v176_v56 }
 0x1a5   :  { %v163_v58 = vsel %vm162_vm7, %v221_v45, %v159_v57 }
 0x1a6   :  { %v165_v59 = vmul.f32 %v163_v58, %v131_v31 }
 0x1a8   :  { %v171_v60 = vmul.f32 %v214_v48, %v165_v59 }
 0x1aa   :  { %v177_v61 = vadd.f32 %v215_v52, %v171_v60 }
 0x1ac   :  { %179 = vst.msk [vmem:[#allocation8 + $0x8] sm:$0xff] %vm81_vm0, %v177_v61 }
 0x1ad   :  { %192 = dma.vmem_to_hbm [thread:$0]  %s185_s16, 256, %s187_s19, [#allocation4], %s325_s29, %s325_s29, %s326_s30  }
 0x1ae   :  { %322 = dma.done.wait [#allocation4], 256  }
 0x1af   :  { %323 = vsyncadd [#allocation4], 4294967040 }
 0x1b0   :  { %197 = vsyncpa [#allocation3], 1 }
 0x1b1   :  { %198 = vsyncpa [#allocation6], 1 }
 0x1b2   :  { %199 = vsyncpa [#allocation4], 1 }

</bundles_post_ra>
